<compile_context>
chip_gen: v6e
topology: v6e:2x2x1
jax: 0.10.0
libtpu: 0.0.40
codegen_flags: <defaults>
</compile_context>

<pallas_src>
import functools

import jax
import jax.numpy as jnp
from jax.experimental import pallas as pl
from jax.experimental.pallas import tpu as pltpu

_MXU_MIN_CIN = 16  # below this the MXU runs at <1% utilization; use the VPU path.


def _stack_conv_kernel(x_ref, w_ref, b_ref, o_ref, *, c_in: int):
    """Fused 1x1-conv + channel concat.

    x_ref : (1, C_in,  TILE_S)   channels on sublanes, spatial on lanes
    w_ref : (C_out, C_in)        resident weight
    b_ref : (C_out, 1)           resident bias
    o_ref : (1, C_in + C_out, TILE_S)
    """
    x = x_ref[0]                                   # (C_in, TILE_S), native dtype
    b = b_ref[...].astype(jnp.float32)             # (C_out, 1) broadcasts over lanes

    if c_in >= _MXU_MIN_CIN:
        # MXU path: native-dtype operands, f32 accumulator, full-precision passes
        # so f32 inputs are not silently truncated to a single bf16 pass.
        y = jnp.dot(
            w_ref[...], x,
            preferred_element_type=jnp.float32,
            precision=jax.lax.Precision.HIGHEST,
        ) + b
    else:
        # VPU path: unrolled C_in broadcast-multiply-accumulate, exact f32 math.
        xf = x.astype(jnp.float32)                 # (C_in, TILE_S)
        wf = w_ref[...].astype(jnp.float32)        # (C_out, C_in)
        y = b                                      # broadcasts to (C_out, TILE_S)
        for k in range(c_in):
            y = y + wf[:, k:k + 1] * xf[k:k + 1, :]

    # Concat along channels = static sublane slices; lane dim stays fully dense.
    # NOTE: with C_in not a multiple of the sublane tile (8 for f32) these are
    # masked sublane stores; they are kept split so the skip branch remains a
    # bit-exact copy of x (a single fused store would need an unaligned sublane
    # concatenate).  The lane axis -- the one that matters for store bandwidth --
    # is dense and a multiple of 128 (or the full extent).
    o_ref[0, :c_in, :] = x
    o_ref[0, c_in:, :] = y.astype(o_ref.dtype)


def _choose_spatial_tile(s: int, c_in: int, c_all: int, dtype_bytes: int,
                         block_byte_budget: int) -> int:
    """Largest lane tile whose double-buffered in+out blocks fit the VMEM budget."""
    bytes_per_lane = 2 * (c_in + c_all) * dtype_bytes       # 2x in + 2x out buffers
    max_lanes = max(128, block_byte_budget // bytes_per_lane)
    if s <= max_lanes:
        return s                    # full extent: one contiguous DMA per (n) block
    max_lanes -= max_lanes % 128
    t = max_lanes
    while t >= 128:                 # prefer a multiple of 128 that divides S exactly
        if s % t == 0:
            return t
        t -= 128
    # Ragged last tile (multiple of 128): Pallas discards out-of-bounds lanes on
    # writeback, so correctness does not depend on the padded-lane contents.
    return max_lanes


def stack_conv_pallas(x_nchw, weight, bias, *, block_byte_budget: int = 12 << 20):
    """Equivalent of Stack_conv.forward (act=None).

    x_nchw : (N, C_in, H, W)
    weight : (C_out, C_in, 1, 1)   -- PyTorch Conv2d weight layout
    bias   : (C_out,)
    returns: (N, C_in + C_out, H, W)
    """
    N, C_in, H, W = x_nchw.shape
    C_out = weight.shape[0]
    C_all = C_in + C_out
    S = H * W
    dtype = x_nchw.dtype
    dtype_bytes = jnp.dtype(dtype).itemsize

    # All three reshapes are layout-preserving (no transpose, no copy).
    x = x_nchw.reshape(N, C_in, S)
    w = weight.reshape(C_out, C_in)
    b = bias.reshape(C_out, 1)

    tile_s = _choose_spatial_tile(S, C_in, C_all, dtype_bytes, block_byte_budget)
    grid = (N, pl.cdiv(S, tile_s))

    # Explicit VMEM limit: enough for double-buffered blocks + resident weight/bias,
    # floored at 16 MiB (v5e default scoped) and capped well under v7x's 64 MiB/TC.
    block_bytes = 2 * (C_in + C_all) * tile_s * dtype_bytes
    const_bytes = (C_out * C_in + C_out) * dtype_bytes
    vmem_limit = int(min(56 << 20, max(16 << 20, 2 * (block_bytes + const_bytes))))

    cost = pl.CostEstimate(
        flops=2 * N * S * C_in * C_out,
        transcendentals=0,
        bytes_accessed=dtype_bytes * (N * C_in * S + N * C_all * S
                                      + C_out * C_in + C_out),
    )

    kernel = functools.partial(_stack_conv_kernel, c_in=C_in)

    out = pl.pallas_call(
        kernel,
        out_shape=jax.ShapeDtypeStruct((N, C_all, S), dtype),
        grid_spec=pltpu.PrefetchScalarGridSpec(
            num_scalar_prefetch=0,
            grid=grid,
            in_specs=[
                pl.BlockSpec((1, C_in, tile_s), lambda n, s: (n, 0, s)),
                pl.BlockSpec((C_out, C_in), lambda n, s: (0, 0)),   # resident weight
                pl.BlockSpec((C_out, 1), lambda n, s: (0, 0)),      # resident bias
            ],
            out_specs=pl.BlockSpec((1, C_all, tile_s), lambda n, s: (n, 0, s)),
        ),
        compiler_params=pltpu.CompilerParams(
            # Both grid axes independent -> megacore / 2-TC sharding on v7x.
            dimension_semantics=("parallel", "parallel"),
            vmem_limit_bytes=vmem_limit,
        ),
        cost_estimate=cost,
    )(x, w, b)

    return out.reshape(N, C_all, H, W)   # free: output is already channel-major


def stack_conv_ref(x_nchw, weight, bias):
    """Pure-JAX reference mirroring the PyTorch forward."""
    w2 = weight.reshape(weight.shape[0], weight.shape[1])     # (C_out, C_in)
    y = jnp.einsum("nchw,oc->nohw", x_nchw, w2,
                   precision=jax.lax.Precision.HIGHEST)
    y = y + bias[None, :, None, None]
    return jnp.concatenate([x_nchw, y], axis=1)


if __name__ == "__main__":
    key = jax.random.PRNGKey(0)
    k_x, k_w, k_b = jax.random.split(key, 3)

    # Small shapes consistent with the module: batch=2, C_in=4, C_out=8, 16x16 spatial.
    N, C_in, C_out, H, W = 2, 4, 8, 16, 16

    x = jax.random.normal(k_x, (N, C_in, H, W), dtype=jnp.float32)
    weight = jax.random.normal(k_w, (C_out, C_in, 1, 1), dtype=jnp.float32) * 0.1
    bias = jax.random.normal(k_b, (C_out,), dtype=jnp.float32) * 0.1

    # Path 1: S fits the VMEM budget -> tile_s == S, contiguous per-sample DMAs.
    out = jax.block_until_ready(stack_conv_pallas(x, weight, bias))
    ref = stack_conv_ref(x, weight, bias)
    assert out.shape == (N, C_in + C_out, H, W), out.shape
    assert jnp.allclose(out, ref, atol=1e-5, rtol=1e-5), "mismatch vs reference (full-S tile)"

    # Path 2: force a small budget so tile_s < S and S % tile_s != 0 (ragged tail),
    # pinning down the partial-block writeback behavior flagged in review.
    H2, W2 = 16, 20                                   # S = 320 -> tile_s = 128, tail 64
    x2 = jax.random.normal(k_x, (N, C_in, H2, W2), dtype=jnp.float32)
    out2 = jax.block_until_ready(
        stack_conv_pallas(x2, weight, bias, block_byte_budget=25_600))
    ref2 = stack_conv_ref(x2, weight, bias)
    assert out2.shape == (N, C_in + C_out, H2, W2), out2.shape
    assert jnp.allclose(out2, ref2, atol=1e-5, rtol=1e-5), "mismatch vs reference (ragged tile)"

    print("KERNEL_OK")
</pallas_src>

<mosaic_0001>
module attributes {stable_mosaic.version = 11 : i64} {
  func.func @_stack_conv_kernel(%arg0: i32, %arg1: i32, %arg2: memref<1x4x256xf32, #tpu.memory_space<vmem>>, %arg3: memref<8x4xf32, #tpu.memory_space<vmem>>, %arg4: memref<8x1xf32, #tpu.memory_space<vmem>>, %arg5: memref<1x12x256xf32, #tpu.memory_space<vmem>>) attributes {dimension_semantics = [#tpu.dimension_semantics<parallel>, #tpu.dimension_semantics<parallel>], iteration_bounds = array<i64: 2, 1>, scalar_prefetch = 0 : i64, scratch_operands = 0 : i64, tpu.core_type = #tpu.core_type<tc>, window_params = [{transform_indices = @transform_0, window_bounds = array<i64: 1, 4, 256>}, {pipeline_mode = #tpu.pipeline_mode<synchronous>, transform_indices = @transform_1, window_bounds = array<i64: 8, 4>}, {pipeline_mode = #tpu.pipeline_mode<synchronous>, transform_indices = @transform_2, window_bounds = array<i64: 8, 1>}, {transform_indices = @transform_3, window_bounds = array<i64: 1, 12, 256>}]} {
    %c0 = arith.constant 0 : index
    %c0_0 = arith.constant 0 : index
    %c0_1 = arith.constant 0 : index
    %0 = vector.load %arg2[%c0, %c0_0, %c0_1] : memref<1x4x256xf32, #tpu.memory_space<vmem>>, vector<1x4x256xf32>
    %1 = vector.shape_cast %0 : vector<1x4x256xf32> to vector<4x256xf32>
    %c0_2 = arith.constant 0 : index
    %c0_3 = arith.constant 0 : index
    %2 = vector.load %arg4[%c0_2, %c0_3] : memref<8x1xf32, #tpu.memory_space<vmem>>, vector<8x1xf32>
    %c0_4 = arith.constant 0 : index
    %c0_5 = arith.constant 0 : index
    %3 = vector.load %arg3[%c0_4, %c0_5] : memref<8x4xf32, #tpu.memory_space<vmem>>, vector<8x4xf32>
    %4 = vector.extract_strided_slice %3 {offsets = [0, 0], sizes = [8, 1], strides = [1, 1]} : vector<8x4xf32> to vector<8x1xf32>
    %5 = vector.extract_strided_slice %1 {offsets = [0, 0], sizes = [1, 256], strides = [1, 1]} : vector<4x256xf32> to vector<1x256xf32>
    %6 = vector.broadcast %4 : vector<8x1xf32> to vector<8x256xf32>
    %7 = vector.broadcast %5 : vector<1x256xf32> to vector<8x256xf32>
    %8 = arith.mulf %6, %7 : vector<8x256xf32>
    %9 = vector.broadcast %2 : vector<8x1xf32> to vector<8x256xf32>
    %10 = arith.addf %9, %8 : vector<8x256xf32>
    %11 = vector.extract_strided_slice %3 {offsets = [0, 1], sizes = [8, 1], strides = [1, 1]} : vector<8x4xf32> to vector<8x1xf32>
    %12 = vector.extract_strided_slice %1 {offsets = [1, 0], sizes = [1, 256], strides = [1, 1]} : vector<4x256xf32> to vector<1x256xf32>
    %13 = vector.broadcast %11 : vector<8x1xf32> to vector<8x256xf32>
    %14 = vector.broadcast %12 : vector<1x256xf32> to vector<8x256xf32>
    %15 = arith.mulf %13, %14 : vector<8x256xf32>
    %16 = arith.addf %10, %15 : vector<8x256xf32>
    %17 = vector.extract_strided_slice %3 {offsets = [0, 2], sizes = [8, 1], strides = [1, 1]} : vector<8x4xf32> to vector<8x1xf32>
    %18 = vector.extract_strided_slice %1 {offsets = [2, 0], sizes = [1, 256], strides = [1, 1]} : vector<4x256xf32> to vector<1x256xf32>
    %19 = vector.broadcast %17 : vector<8x1xf32> to vector<8x256xf32>
    %20 = vector.broadcast %18 : vector<1x256xf32> to vector<8x256xf32>
    %21 = arith.mulf %19, %20 : vector<8x256xf32>
    %22 = arith.addf %16, %21 : vector<8x256xf32>
    %23 = vector.extract_strided_slice %3 {offsets = [0, 3], sizes = [8, 1], strides = [1, 1]} : vector<8x4xf32> to vector<8x1xf32>
    %24 = vector.extract_strided_slice %1 {offsets = [3, 0], sizes = [1, 256], strides = [1, 1]} : vector<4x256xf32> to vector<1x256xf32>
    %25 = vector.broadcast %23 : vector<8x1xf32> to vector<8x256xf32>
    %26 = vector.broadcast %24 : vector<1x256xf32> to vector<8x256xf32>
    %27 = arith.mulf %25, %26 : vector<8x256xf32>
    %28 = arith.addf %22, %27 : vector<8x256xf32>
    %c0_6 = arith.constant 0 : index
    %c0_7 = arith.constant 0 : index
    %c0_8 = arith.constant 0 : index
    %29 = vector.load %arg5[%c0_6, %c0_7, %c0_8] : memref<1x12x256xf32, #tpu.memory_space<vmem>>, vector<1x4x256xf32>
    %30 = vector.shape_cast %29 : vector<1x4x256xf32> to vector<4x256xf32>
    %31 = vector.shape_cast %1 : vector<4x256xf32> to vector<1x4x256xf32>
    tpu.vector_store %arg5[%c0_6, %c0_7, %c0_8], %31 {strides = array<i32>} : memref<1x12x256xf32, #tpu.memory_space<vmem>>, vector<1x4x256xf32>,
    %c0_9 = arith.constant 0 : index
    %c4 = arith.constant 4 : index
    %c0_10 = arith.constant 0 : index
    %32 = vector.load %arg5[%c0_9, %c4, %c0_10] : memref<1x12x256xf32, #tpu.memory_space<vmem>>, vector<1x8x256xf32>
    %33 = vector.shape_cast %32 : vector<1x8x256xf32> to vector<8x256xf32>
    %34 = vector.shape_cast %28 : vector<8x256xf32> to vector<1x8x256xf32>
    tpu.vector_store %arg5[%c0_9, %c4, %c0_10], %34 {strides = array<i32>} : memref<1x12x256xf32, #tpu.memory_space<vmem>>, vector<1x8x256xf32>,
    return
  }
  func.func @transform_0(%arg0: i32, %arg1: i32) -> (i32, i32, i32) {
    %c0_i32 = arith.constant 0 : i32
    %c0_i32_0 = arith.constant 0 : i32
    return %arg0, %c0_i32, %arg1 : i32, i32, i32
  }
  func.func @transform_1(%arg0: i32, %arg1: i32) -> (i32, i32) {
    %c0_i32 = arith.constant 0 : i32
    %c0_i32_0 = arith.constant 0 : i32
    %c0_i32_1 = arith.constant 0 : i32
    return %c0_i32, %c0_i32_0 : i32, i32
  }
  func.func @transform_2(%arg0: i32, %arg1: i32) -> (i32, i32) {
    %c0_i32 = arith.constant 0 : i32
    %c0_i32_0 = arith.constant 0 : i32
    %c0_i32_1 = arith.constant 0 : i32
    return %c0_i32, %c0_i32_0 : i32, i32
  }
  func.func @transform_3(%arg0: i32, %arg1: i32) -> (i32, i32, i32) {
    %c0_i32 = arith.constant 0 : i32
    %c0_i32_0 = arith.constant 0 : i32
    return %arg0, %c0_i32, %arg1 : i32, i32, i32
  }
}

</mosaic_0001>

<bundles_post_ra>
// kernel: tpu_custom_call.1
= control target key start
LH: loop header
LB: loop body
LE: loop exit
PB: predicated region body
PF: predicated region fallthrough
CT: control target
= control target key end

     0   :  { %s519_s12 = smov 0   ;;  %s521_s13 = smov 0   ;;  %s564_s0 = inlined_call_operand.vmem [shape: f32[2,4,256], index: 0, kind: input, shape index: {}]   ;;  %s565_s1 = inlined_call_operand.vmem [shape: f32[8,4], index: 1, kind: input, shape index: {}]   ;;  %s566_s2 = inlined_call_operand.vmem [shape: f32[8,1], index: 2, kind: input, shape index: {}]   ;;  %s567_s3 = inlined_call_operand.vmem [shape: f32[2,12,256], index: 3, kind: output, shape index: {}]  }
   0x1   :  { %s523_s14 = smov 0  }
   0x2 LB: > { %s25_s15 = sadd.s32 1, %s489_s13  ;;  %p429_p0 = scmp.ge.s32.totalorder %s493_s14, 1  ;;  %s493_s14 = sphi %s523_s14, %s13_s14   ;;  %s489_s13 = sphi %s521_s13, %s569_s13   ;;  %s485_s12 = sphi %s519_s12, %s568_s12  }
   0x3   : > { %p27_p1 = scmp.ge.s32.totalorder %s25_s15, 2  ;;  %p158_p2 = scmp.lt.s32.totalorder %s493_s14, 3 }
   0x5   : > { %s571_s15 = smov (%p27_p1, %s25_s15), 0  ;;  %p159_p3 = pnand %p429_p0, %p158_p2 }
   0x6   : > { %p191_p4 = scmp.lt.s32.totalorder (!%p159_p3), %s485_s12, 1 }
   0x7   : > { %162 = sbr.rel (%p159_p3) target bundleno = 154 (0x9a), region = 32 }
   0xc   : > { %v212_v0 = vld [vmem:[%s565_s1] sm:$0xff]  ;;  %v495_v1 = vmov 0   ;;  %v496_v2 = vmov 1   ;;  %s573_s12 = smov (!%p191_p4, %s485_s12), 1  ;;  %v497_v4 = vmov 2   ;;  %v498_v6 = vmov 3  }
   0xd   : > { %466 = vset.pattern.permute.xlu0 %v495_v1  ;;  %467 = vset.pattern.permute.xlu1 %v496_v2  ;;  %v211_v3 = vld [vmem:[%s566_s2] sm:$0xff]  ;;  %s436_s20 = sshll.u32 %s573_s12, 3  ;;  %s437_s24 = sshll.u32 %s573_s12, 5  ;;  %v219_v8 = vlaneseq }
   0xe   : > { %215 = vperm.xlu0 %466, %v212_v0   ;;  %247 = vperm.xlu1 %467, %v212_v0   ;;  %s198_s23 = scalar_lea.vmem %s564_s0, %s436_s20  ;;  %s549_s27 = scalar_lea.vmem %s567_s3, %s437_s24 }
   0xf   : > { %v210_v5 = vld [vmem:[%s198_s23] sm:$0xff]  ;;  %v220_v9 = vshrl.u32 %v219_v8, 7 }
  0x10   : > { %326 = vst [vmem:[%s549_s27] sm:$0xf] %v210_v5  ;;  %v324_v7 = vcombine.high %v210_v5, %v210_v5 }
  0x11   : > { %v221_v10 = vsub.s32 0, %v220_v9  ;;  %v225_v11 = vsub.s32 4, %v220_v9  ;;  %v252_v12 = vsub.s32 1, %v220_v9  ;;  %v256_v13 = vsub.s32 5, %v220_v9 }
  0x12   : > { %241 = vperm.xlu0 %466, %v211_v3   ;;  %468 = vset.pattern.permute.xlu1 %v497_v4  ;;  %327 = vst [vmem:[%s549_s27 + $0x8] sm:$0xf] %v324_v7  ;;  %v278_v14 = vsub.s32 2, %v220_v9  ;;  %v282_v15 = vsub.s32 6, %v220_v9  ;;  %v304_v22 = vsub.s32 3, %v220_v9  ;;  %v308_v23 = vsub.s32 7, %v220_v9 }
  0x13   : > { %273 = vperm.xlu1 %468, %v212_v0   ;;  %v222_v16 = vrot.slane %v210_v5, %v221_v10  ;;  %v226_v17 = vrot.slane %v210_v5, %v225_v11  ;;  %v253_v18 = vrot.slane %v210_v5, %v252_v12  ;;  %v257_v19 = vrot.slane %v210_v5, %v256_v13 }
  0x14   : > { %v279_v20 = vrot.slane %v210_v5, %v278_v14  ;;  %v283_v21 = vrot.slane %v210_v5, %v282_v15  ;;  %v305_v32 = vrot.slane %v210_v5, %v304_v22  ;;  %v309_v33 = vrot.slane %v210_v5, %v308_v23 }
  0x15   : > { %v232_v24 = vrot.slane %v222_v16, %v221_v10  ;;  %v236_v25 = vrot.slane %v226_v17, %v221_v10  ;;  %v263_v28 = vrot.slane %v253_v18, %v252_v12  ;;  %v267_v29 = vrot.slane %v257_v19, %v252_v12 }
  0x16   : > { %469 = vset.pattern.permute.xlu0 %v498_v6  ;;  %v289_v30 = vrot.slane %v279_v20, %v278_v14  ;;  %v293_v31 = vrot.slane %v283_v21, %v278_v14  ;;  %v315_v44 = vrot.slane %v305_v32, %v304_v22  ;;  %v319_v45 = vrot.slane %v309_v33, %v304_v22 }
  0x17   : > { %299 = vperm.xlu0 %469, %v212_v0  }
  0x89   : > { %v216_v26 = vpop.permute.xlu0 %215  ;;  %v248_v27 = vpop.permute.xlu1 %247 }
  0x8a   : > { %v237_v34 = vmul.f32 %v232_v24, %v216_v26  ;;  %v238_v35 = vmul.f32 %v236_v25, %v216_v26  ;;  %v268_v37 = vmul.f32 %v263_v28, %v248_v27  ;;  %v269_v38 = vmul.f32 %v267_v29, %v248_v27 }
  0x8d   : > { %v242_v36 = vpop.permute.xlu0 %241 }
  0x8e   : > { %v244_v39 = vadd.f32 %v242_v36, %v237_v34  ;;  %v245_v40 = vadd.f32 %v242_v36, %v238_v35  ;;  %v274_v41 = vpop.permute.xlu1 %273 }
  0x8f   : > { %v294_v42 = vmul.f32 %v289_v30, %v274_v41  ;;  %v295_v43 = vmul.f32 %v293_v31, %v274_v41 }
  0x90   : > { %v270_v46 = vadd.f32 %v268_v37, %v244_v39  ;;  %v271_v47 = vadd.f32 %v269_v38, %v245_v40 }
  0x92   : > { %v296_v48 = vadd.f32 %v294_v42, %v270_v46  ;;  %v297_v49 = vadd.f32 %v295_v43, %v271_v47  ;;  %v300_v50 = vpop.permute.xlu0 %299 }
  0x93   : > { %v320_v51 = vmul.f32 %v315_v44, %v300_v50  ;;  %v321_v52 = vmul.f32 %v319_v45, %v300_v50 }
  0x95   : > { %v322_v53 = vadd.f32 %v320_v51, %v296_v48  ;;  %v323_v54 = vadd.f32 %v321_v52, %v297_v49 }
  0x97   : > { %v330_v55 = vrot.slane %v322_v53, 4  ;;  %v331_v56 = vrot.slane %v323_v54, 4 }
  0x99   : > { %334 = vst [vmem:[%s549_s27 + $0x10] ss:$-12 sps:$4 sm:$0xff] %v330_v55   ;;  %335 = vst [vmem:[%s549_s27 + $0x18] ss:$-12 sps:$4 sm:$0xff] %v331_v56  }
  0x9a PF: > { %s13_s14 = sadd.s32 1, %s493_s14   ;;  %s568_s12 = smov %s489_s13 }
  0x9b   : > { %p10_p5 = scmp.ge.s32.totalorder %s13_s14, 4   ;;  %s569_s13 = smov %s571_s15 }
  0x9d   :  { %12 = sbr.rel (!%p10_p5) target bundleno = 2 (0x2), region = 62 }

</bundles_post_ra>
